<compile_context>
chip_gen: v7x
topology: tpu7x:2x2x1
jax: 0.10.0
libtpu: 0.0.40
codegen_flags: <defaults>
</compile_context>

<pallas_src>
import functools

import jax
import jax.numpy as jnp
from jax import lax
from jax.experimental import pallas as pl
from jax.experimental.pallas import tpu as pltpu


def _round_up(x, m):
    return (x + m - 1) // m * m


# ----------------------------------------------------------------------------
# Pallas kernel: entire FeedForward forward for one tile of rows (transposed).
# ----------------------------------------------------------------------------
def ff_kernel(x0_ref, x1_ref, s0_ref, s1_ref, win_ref, wout_ref,
              y0_ref, y1_ref, sin_ref, sout_ref, *, D0, D1, H0, H1):
    eps = 1e-12
    f32 = jnp.float32

    t0 = x0_ref[...].astype(f32)                                   # (D0, T)
    t1 = x1_ref[...].astype(f32)                                   # (3, D1, T)

    # --- prenorm: RMSNorm per degree (L2 over m, then RMS over channels) ---
    ms0 = jnp.sum(t0 * t0, axis=0, keepdims=True) * (1.0 / D0)     # (1, T)
    inv0 = lax.rsqrt(jnp.maximum(ms0, eps * eps))                  # == 1/max(rms, eps)
    n0 = t0 * inv0 * s0_ref[...].astype(f32)                       # (D0, T)

    sq1 = t1[0] * t1[0] + t1[1] * t1[1] + t1[2] * t1[2]            # (D1, T)
    ms1 = jnp.sum(sq1, axis=0, keepdims=True) * (1.0 / D1)         # (1, T)
    inv1 = lax.rsqrt(jnp.maximum(ms1, eps * eps))                  # (1, T)
    n1 = t1 * (inv1 * s1_ref[...].astype(f32))                     # (3, D1, T)

    # --- include_htype_norms: per-channel L2 over m of normalized degree-1 ---
    h = jnp.sqrt(n1[0] * n1[0] + n1[1] * n1[1] + n1[2] * n1[2])    # (D1, T)

    # --- project_in: stack everything, ONE block-structured matmul -----------
    # scratch rows: [0:D0]=n0, [D0:D0+D1]=h, then n1[m] for m=0..2
    sin_ref[0:D0, :] = n0
    sin_ref[D0:D0 + D1, :] = h
    for m in range(3):                                             # static unroll
        base = D0 + D1 + m * D1
        sin_ref[base:base + D1, :] = n1[m]

    pre = jnp.dot(win_ref[...], sin_ref[...],
                  preferred_element_type=f32)                      # (4*H1+H0, T)

    # rows [0:H1] = gate_pre, [H1:H1+H0] = silu_pre, then the 3 degree-1 hidden slabs
    gate = jax.nn.sigmoid(pre[0:H1])                               # (H1, T)
    g0 = jax.nn.silu(pre[H1:H1 + H0])                              # (H0, T)

    # --- project_out: stack [g0; gated degree-1 hidden], ONE block-diag matmul ---
    sout_ref[0:H0, :] = g0
    for m in range(3):
        src = H1 + H0 + m * H1
        dst = H0 + m * H1
        sout_ref[dst:dst + H1, :] = pre[src:src + H1] * gate

    out = jnp.dot(wout_ref[...], sout_ref[...],
                  preferred_element_type=f32)                      # (D0+3*D1, T)

    y0_ref[...] = out[0:D0].astype(y0_ref.dtype)
    for m in range(3):
        base = D0 + m * D1
        y1_ref[m, :, :] = out[base:base + D1].astype(y1_ref.dtype)


# ----------------------------------------------------------------------------
# Parameter construction mirroring FeedForward.__init__ (PyTorch layout).
# ----------------------------------------------------------------------------
def make_params(fiber=(16, 8), mult=4, init_out_zero=False, seed=0):
    """Note: the PyTorch module defaults to init_out_zero=True (zero project_out),
    which makes the output identically zero; default False here for a non-trivial check."""
    D0, D1 = fiber
    H0, H1 = D0 * mult, D1 * mult
    Htot = H0 + H1
    Din0 = D0 + D1                       # include_htype_norms widens type-0 input

    k = jax.random.PRNGKey(seed)
    k1, k2, k3, k4 = jax.random.split(k, 4)

    return dict(
        scale0=jnp.ones((D0, 1), jnp.float32),        # Norm transforms (ones init)
        scale1=jnp.ones((D1, 1), jnp.float32),
        w0_in=jax.random.normal(k1, (Din0, Htot), jnp.float32) / jnp.sqrt(Din0),
        w1_in=jax.random.normal(k2, (D1, H1), jnp.float32) / jnp.sqrt(D1),
        w0_out=(jnp.zeros((H0, D0), jnp.float32) if init_out_zero
                else jax.random.normal(k3, (H0, D0), jnp.float32) / jnp.sqrt(H0)),
        w1_out=(jnp.zeros((H1, D1), jnp.float32) if init_out_zero
                else jax.random.normal(k4, (H1, D1), jnp.float32) / jnp.sqrt(H1)),
    )


# ----------------------------------------------------------------------------
# Wrapper: layout plumbing (lane-dense transposed), weight packing, pallas_call
# ----------------------------------------------------------------------------
@functools.partial(jax.jit, static_argnames=("tile",))
def feed_forward_pallas(f0, f1, params, tile=2048):
    """f0: [b, n, D0, 1], f1: [b, n, D1, 3] -> (y0 [b,n,D0,1], y1 [b,n,D1,3])."""
    b, n, D0, m0 = f0.shape
    _, _, D1, M = f1.shape
    N = b * n
    assert m0 == 1 and M == 3
    assert tile % 128 == 0, "row tile must be a multiple of 128 (lane width)"
    # sublane-aligned scratch slices require channel counts that are multiples of 8
    assert D0 % 8 == 0 and D1 % 8 == 0

    H1 = params["w1_in"].shape[1]
    H0 = params["w0_out"].shape[0]

    # Effective tile / padded row count (rows live on the lane axis).
    # Cap at ~half the lanes so medium-sized problems still get >=2 grid steps
    # (lets v7x shard the 'parallel' axis across both TensorCores).
    n_lanes = _round_up(N, 128)
    tile_cap = tile
    if n_lanes >= 256:
        tile_cap = min(tile_cap, _round_up(-(-n_lanes // 2), 128))
    tile_eff = min(tile_cap, n_lanes)
    Npad = _round_up(N, tile_eff)
    pad = Npad - N

    # ----- activations: transpose to (channels, rows) and zero-pad lanes -----
    # TODO(synk): keep this transposed layout persistent across adjacent layers
    # (or fuse into producer/consumer kernels) to avoid these extra HBM passes.
    x0 = f0.reshape(N, D0).T                                    # (D0, N)
    x1 = jnp.transpose(f1.reshape(N, D1, 3), (2, 1, 0))         # (3, D1, N)
    if pad:
        x0 = jnp.pad(x0, ((0, 0), (0, pad)))
        x1 = jnp.pad(x1, ((0, 0), (0, 0), (0, pad)))

    # ----- pack weights into two block-structured matrices (pre-transposed) -----
    w0i = params["w0_in"]      # (D0+D1, H1+H0); cols [0:H1] = gate, [H1:] = silu
    w1i = params["w1_in"]      # (D1, H1)
    w0o = params["w0_out"]     # (H0, D0)
    w1o = params["w1_out"]     # (H1, D1)

    K_in = D0 + 4 * D1         # stacked input rows: n0, h, n1_x, n1_y, n1_z
    R_in = 4 * H1 + H0         # gate_pre, silu_pre, h1_x, h1_y, h1_z
    win = jnp.zeros((R_in, K_in), jnp.float32)
    w0iT = w0i.T.astype(jnp.float32)                            # (H1+H0, D0+D1)
    win = win.at[0:H1, 0:D0 + D1].set(w0iT[:H1])                # gate rows  <- [n0; h]
    win = win.at[H1:H1 + H0, 0:D0 + D1].set(w0iT[H1:])          # silu rows  <- [n0; h]
    w1iT = w1i.T.astype(jnp.float32)                            # (H1, D1)
    for m in range(3):
        r = H1 + H0 + m * H1
        c = D0 + D1 + m * D1
        win = win.at[r:r + H1, c:c + D1].set(w1iT)              # h1_m <- n1_m

    K_out = H0 + 3 * H1        # stacked gated rows: g0, g1_x, g1_y, g1_z
    R_out = D0 + 3 * D1        # y0, y1_x, y1_y, y1_z
    wout = jnp.zeros((R_out, K_out), jnp.float32)
    wout = wout.at[0:D0, 0:H0].set(w0o.T.astype(jnp.float32))
    w1oT = w1o.T.astype(jnp.float32)                            # (D1, H1)
    for m in range(3):
        r = D0 + m * D1
        c = H0 + m * H1
        wout = wout.at[r:r + D1, c:c + H1].set(w1oT)

    s0 = params["scale0"].reshape(D0, 1).astype(jnp.float32)
    s1 = params["scale1"].reshape(D1, 1).astype(jnp.float32)

    grid = (Npad // tile_eff,)
    out_shape = (jax.ShapeDtypeStruct((D0, Npad), f0.dtype),
                 jax.ShapeDtypeStruct((3, D1, Npad), f1.dtype))

    in_specs = [
        pl.BlockSpec((D0, tile_eff), lambda i: (0, i)),
        pl.BlockSpec((3, D1, tile_eff), lambda i: (0, 0, i)),
        pl.BlockSpec((D0, 1), lambda i: (0, 0)),
        pl.BlockSpec((D1, 1), lambda i: (0, 0)),
        pl.BlockSpec((R_in, K_in), lambda i: (0, 0)),
        pl.BlockSpec((R_out, K_out), lambda i: (0, 0)),
    ]
    out_specs = (
        pl.BlockSpec((D0, tile_eff), lambda i: (0, i)),
        pl.BlockSpec((3, D1, tile_eff), lambda i: (0, 0, i)),
    )

    kernel = functools.partial(ff_kernel, D0=D0, D1=D1, H0=H0, H1=H1)

    y0, y1 = pl.pallas_call(
        kernel,
        grid=grid,
        in_specs=in_specs,
        out_specs=out_specs,
        out_shape=out_shape,
        scratch_shapes=[pltpu.VMEM((K_in, tile_eff), jnp.float32),
                        pltpu.VMEM((K_out, tile_eff), jnp.float32)],
        compiler_params=pltpu.CompilerParams(
            dimension_semantics=("parallel",),
        ),
    )(x0, x1, s0, s1, win, wout)

    # back to PyTorch layout
    y0 = y0[:, :N].T.reshape(b, n, D0, 1)
    y1 = jnp.transpose(y1[:, :, :N], (2, 1, 0)).reshape(b, n, D1, 3)
    return y0, y1


# ----------------------------------------------------------------------------
# Pure-JAX reference in the original PyTorch layout (for verification)
# ----------------------------------------------------------------------------
def feed_forward_ref(f0, f1, params):
    eps = 1e-12
    s0 = params["scale0"].reshape(-1, 1)
    s1 = params["scale1"].reshape(-1, 1)
    w0i, w1i = params["w0_in"], params["w1_in"]
    w0o, w1o = params["w0_out"], params["w1_out"]
    H1 = w1i.shape[1]

    def norm(t, scale):
        dim = t.shape[-2]
        l2 = jnp.sqrt(jnp.sum(t * t, axis=-1, keepdims=True))
        rms = jnp.sqrt(jnp.sum(l2 * l2, axis=-2, keepdims=True)) * dim ** (-0.5)
        return t / jnp.maximum(rms, eps) * scale

    n0 = norm(f0, s0)
    n1 = norm(f1, s1)
    h = jnp.sqrt(jnp.sum(n1 * n1, axis=-1, keepdims=True))          # [b,n,D1,1]
    cat0 = jnp.concatenate([n0, h], axis=-2)                        # [b,n,D0+D1,1]

    hid0 = jnp.einsum('bndm,de->bnem', cat0, w0i)
    hid1 = jnp.einsum('bndm,de->bnem', n1, w1i)

    gate = jax.nn.sigmoid(hid0[..., :H1, :])
    g0 = jax.nn.silu(hid0[..., H1:, :])
    g1 = hid1 * gate

    y0 = jnp.einsum('bndm,de->bnem', g0, w0o)
    y1 = jnp.einsum('bndm,de->bnem', g1, w1o)
    return y0, y1


if __name__ == "__main__":
    fiber = (16, 8)          # (type-0 channels, type-1 channels)
    b, n = 2, 8

    key = jax.random.PRNGKey(0)
    kf0, kf1 = jax.random.split(key)
    f0 = jax.random.normal(kf0, (b, n, fiber[0], 1), jnp.float32)
    f1 = jax.random.normal(kf1, (b, n, fiber[1], 3), jnp.float32)

    params = make_params(fiber=fiber, mult=4, init_out_zero=False, seed=0)

    y0, y1 = feed_forward_pallas(f0, f1, params)
    jax.block_until_ready((y0, y1))

    r0, r1 = feed_forward_ref(f0, f1, params)
    assert y0.shape == (b, n, fiber[0], 1) and y1.shape == (b, n, fiber[1], 3)
    # Tolerance covers bf16 rounding at the MXU (default dot precision) in both paths.
    assert jnp.allclose(y0, r0, rtol=2e-2, atol=2e-2), "degree-0 mismatch"
    assert jnp.allclose(y1, r1, rtol=2e-2, atol=2e-2), "degree-1 mismatch"

    print("KERNEL_OK")
</pallas_src>

<mosaic_0001>
module attributes {stable_mosaic.version = 11 : i64} {
  func.func @ff_kernel(%arg0: i32, %arg1: memref<16x128xf32, #tpu.memory_space<vmem>>, %arg2: memref<3x8x128xf32, #tpu.memory_space<vmem>>, %arg3: memref<16x1xf32, #tpu.memory_space<vmem>>, %arg4: memref<8x1xf32, #tpu.memory_space<vmem>>, %arg5: memref<192x48xf32, #tpu.memory_space<vmem>>, %arg6: memref<40x160xf32, #tpu.memory_space<vmem>>, %arg7: memref<16x128xf32, #tpu.memory_space<vmem>>, %arg8: memref<3x8x128xf32, #tpu.memory_space<vmem>>, %arg9: memref<48x128xf32, #tpu.memory_space<vmem>>, %arg10: memref<160x128xf32, #tpu.memory_space<vmem>>) attributes {dimension_semantics = [#tpu.dimension_semantics<parallel>], iteration_bounds = array<i64: 1>, scalar_prefetch = 0 : i64, scratch_operands = 2 : i64, tpu.core_type = #tpu.core_type<tc>, window_params = [{transform_indices = @transform_0, window_bounds = array<i64: 16, 128>}, {transform_indices = @transform_1, window_bounds = array<i64: 3, 8, 128>}, {pipeline_mode = #tpu.pipeline_mode<synchronous>, transform_indices = @transform_2, window_bounds = array<i64: 16, 1>}, {pipeline_mode = #tpu.pipeline_mode<synchronous>, transform_indices = @transform_3, window_bounds = array<i64: 8, 1>}, {pipeline_mode = #tpu.pipeline_mode<synchronous>, transform_indices = @transform_4, window_bounds = array<i64: 192, 48>}, {pipeline_mode = #tpu.pipeline_mode<synchronous>, transform_indices = @transform_5, window_bounds = array<i64: 40, 160>}, {transform_indices = @transform_6, window_bounds = array<i64: 16, 128>}, {transform_indices = @transform_7, window_bounds = array<i64: 3, 8, 128>}]} {
    %c0 = arith.constant 0 : index
    %c0_0 = arith.constant 0 : index
    %0 = vector.load %arg1[%c0, %c0_0] : memref<16x128xf32, #tpu.memory_space<vmem>>, vector<16x128xf32>
    %c0_1 = arith.constant 0 : index
    %c0_2 = arith.constant 0 : index
    %c0_3 = arith.constant 0 : index
    %1 = vector.load %arg2[%c0_1, %c0_2, %c0_3] : memref<3x8x128xf32, #tpu.memory_space<vmem>>, vector<3x8x128xf32>
    %2 = arith.mulf %0, %0 : vector<16x128xf32>
    %cst = arith.constant dense<0.000000e+00> : vector<128xf32>
    %3 = vector.multi_reduction <add>, %2, %cst [0] : vector<16x128xf32> to vector<128xf32>
    %4 = vector.shape_cast %3 : vector<128xf32> to vector<1x128xf32>
    %cst_4 = arith.constant 6.250000e-02 : f32
    %5 = vector.broadcast %cst_4 : f32 to vector<1x128xf32>
    %6 = arith.mulf %4, %5 : vector<1x128xf32>
    %cst_5 = arith.constant 1.000000e-24 : f32
    %7 = vector.broadcast %cst_5 : f32 to vector<1x128xf32>
    %8 = arith.maximumf %6, %7 : vector<1x128xf32>
    %9 = math.rsqrt %8 : vector<1x128xf32>
    %10 = vector.broadcast %9 : vector<1x128xf32> to vector<16x128xf32>
    %11 = arith.mulf %0, %10 : vector<16x128xf32>
    %c0_6 = arith.constant 0 : index
    %c0_7 = arith.constant 0 : index
    %12 = vector.load %arg3[%c0_6, %c0_7] : memref<16x1xf32, #tpu.memory_space<vmem>>, vector<16x1xf32>
    %13 = vector.broadcast %12 : vector<16x1xf32> to vector<16x128xf32>
    %14 = arith.mulf %11, %13 : vector<16x128xf32>
    %15 = vector.extract_strided_slice %1 {offsets = [0, 0, 0], sizes = [1, 8, 128], strides = [1, 1, 1]} : vector<3x8x128xf32> to vector<1x8x128xf32>
    %16 = vector.shape_cast %15 : vector<1x8x128xf32> to vector<8x128xf32>
    %17 = vector.extract_strided_slice %1 {offsets = [0, 0, 0], sizes = [1, 8, 128], strides = [1, 1, 1]} : vector<3x8x128xf32> to vector<1x8x128xf32>
    %18 = vector.shape_cast %17 : vector<1x8x128xf32> to vector<8x128xf32>
    %19 = arith.mulf %16, %18 : vector<8x128xf32>
    %20 = vector.extract_strided_slice %1 {offsets = [1, 0, 0], sizes = [1, 8, 128], strides = [1, 1, 1]} : vector<3x8x128xf32> to vector<1x8x128xf32>
    %21 = vector.shape_cast %20 : vector<1x8x128xf32> to vector<8x128xf32>
    %22 = vector.extract_strided_slice %1 {offsets = [1, 0, 0], sizes = [1, 8, 128], strides = [1, 1, 1]} : vector<3x8x128xf32> to vector<1x8x128xf32>
    %23 = vector.shape_cast %22 : vector<1x8x128xf32> to vector<8x128xf32>
    %24 = arith.mulf %21, %23 : vector<8x128xf32>
    %25 = arith.addf %19, %24 : vector<8x128xf32>
    %26 = vector.extract_strided_slice %1 {offsets = [2, 0, 0], sizes = [1, 8, 128], strides = [1, 1, 1]} : vector<3x8x128xf32> to vector<1x8x128xf32>
    %27 = vector.shape_cast %26 : vector<1x8x128xf32> to vector<8x128xf32>
    %28 = vector.extract_strided_slice %1 {offsets = [2, 0, 0], sizes = [1, 8, 128], strides = [1, 1, 1]} : vector<3x8x128xf32> to vector<1x8x128xf32>
    %29 = vector.shape_cast %28 : vector<1x8x128xf32> to vector<8x128xf32>
    %30 = arith.mulf %27, %29 : vector<8x128xf32>
    %31 = arith.addf %25, %30 : vector<8x128xf32>
    %cst_8 = arith.constant dense<0.000000e+00> : vector<128xf32>
    %32 = vector.multi_reduction <add>, %31, %cst_8 [0] : vector<8x128xf32> to vector<128xf32>
    %33 = vector.shape_cast %32 : vector<128xf32> to vector<1x128xf32>
    %cst_9 = arith.constant 1.250000e-01 : f32
    %34 = vector.broadcast %cst_9 : f32 to vector<1x128xf32>
    %35 = arith.mulf %33, %34 : vector<1x128xf32>
    %cst_10 = arith.constant 1.000000e-24 : f32
    %36 = vector.broadcast %cst_10 : f32 to vector<1x128xf32>
    %37 = arith.maximumf %35, %36 : vector<1x128xf32>
    %38 = math.rsqrt %37 : vector<1x128xf32>
    %c0_11 = arith.constant 0 : index
    %c0_12 = arith.constant 0 : index
    %39 = vector.load %arg4[%c0_11, %c0_12] : memref<8x1xf32, #tpu.memory_space<vmem>>, vector<8x1xf32>
    %40 = vector.broadcast %38 : vector<1x128xf32> to vector<8x128xf32>
    %41 = vector.broadcast %39 : vector<8x1xf32> to vector<8x128xf32>
    %42 = arith.mulf %40, %41 : vector<8x128xf32>
    %43 = vector.shape_cast %42 : vector<8x128xf32> to vector<1x8x128xf32>
    %44 = vector.broadcast %43 : vector<1x8x128xf32> to vector<3x8x128xf32>
    %45 = arith.mulf %1, %44 : vector<3x8x128xf32>
    %46 = vector.extract_strided_slice %45 {offsets = [0, 0, 0], sizes = [1, 8, 128], strides = [1, 1, 1]} : vector<3x8x128xf32> to vector<1x8x128xf32>
    %47 = vector.shape_cast %46 : vector<1x8x128xf32> to vector<8x128xf32>
    %48 = vector.extract_strided_slice %45 {offsets = [0, 0, 0], sizes = [1, 8, 128], strides = [1, 1, 1]} : vector<3x8x128xf32> to vector<1x8x128xf32>
    %49 = vector.shape_cast %48 : vector<1x8x128xf32> to vector<8x128xf32>
    %50 = arith.mulf %47, %49 : vector<8x128xf32>
    %51 = vector.extract_strided_slice %45 {offsets = [1, 0, 0], sizes = [1, 8, 128], strides = [1, 1, 1]} : vector<3x8x128xf32> to vector<1x8x128xf32>
    %52 = vector.shape_cast %51 : vector<1x8x128xf32> to vector<8x128xf32>
    %53 = vector.extract_strided_slice %45 {offsets = [1, 0, 0], sizes = [1, 8, 128], strides = [1, 1, 1]} : vector<3x8x128xf32> to vector<1x8x128xf32>
    %54 = vector.shape_cast %53 : vector<1x8x128xf32> to vector<8x128xf32>
    %55 = arith.mulf %52, %54 : vector<8x128xf32>
    %56 = arith.addf %50, %55 : vector<8x128xf32>
    %57 = vector.extract_strided_slice %45 {offsets = [2, 0, 0], sizes = [1, 8, 128], strides = [1, 1, 1]} : vector<3x8x128xf32> to vector<1x8x128xf32>
    %58 = vector.shape_cast %57 : vector<1x8x128xf32> to vector<8x128xf32>
    %59 = vector.extract_strided_slice %45 {offsets = [2, 0, 0], sizes = [1, 8, 128], strides = [1, 1, 1]} : vector<3x8x128xf32> to vector<1x8x128xf32>
    %60 = vector.shape_cast %59 : vector<1x8x128xf32> to vector<8x128xf32>
    %61 = arith.mulf %58, %60 : vector<8x128xf32>
    %62 = arith.addf %56, %61 : vector<8x128xf32>
    %63 = math.sqrt %62 : vector<8x128xf32>
    %c0_13 = arith.constant 0 : index
    %c0_14 = arith.constant 0 : index
    %64 = vector.load %arg9[%c0_13, %c0_14] : memref<48x128xf32, #tpu.memory_space<vmem>>, vector<16x128xf32>
    tpu.vector_store %arg9[%c0_13, %c0_14], %14 {strides = array<i32>} : memref<48x128xf32, #tpu.memory_space<vmem>>, vector<16x128xf32>,
    %c16 = arith.constant 16 : index
    %c0_15 = arith.constant 0 : index
    %65 = vector.load %arg9[%c16, %c0_15] : memref<48x128xf32, #tpu.memory_space<vmem>>, vector<8x128xf32>
    tpu.vector_store %arg9[%c16, %c0_15], %63 {strides = array<i32>} : memref<48x128xf32, #tpu.memory_space<vmem>>, vector<8x128xf32>,
    %66 = vector.extract_strided_slice %45 {offsets = [0, 0, 0], sizes = [1, 8, 128], strides = [1, 1, 1]} : vector<3x8x128xf32> to vector<1x8x128xf32>
    %67 = vector.shape_cast %66 : vector<1x8x128xf32> to vector<8x128xf32>
    %c24 = arith.constant 24 : index
    %c0_16 = arith.constant 0 : index
    %68 = vector.load %arg9[%c24, %c0_16] : memref<48x128xf32, #tpu.memory_space<vmem>>, vector<8x128xf32>
    tpu.vector_store %arg9[%c24, %c0_16], %67 {strides = array<i32>} : memref<48x128xf32, #tpu.memory_space<vmem>>, vector<8x128xf32>,
    %69 = vector.extract_strided_slice %45 {offsets = [1, 0, 0], sizes = [1, 8, 128], strides = [1, 1, 1]} : vector<3x8x128xf32> to vector<1x8x128xf32>
    %70 = vector.shape_cast %69 : vector<1x8x128xf32> to vector<8x128xf32>
    %c32 = arith.constant 32 : index
    %c0_17 = arith.constant 0 : index
    %71 = vector.load %arg9[%c32, %c0_17] : memref<48x128xf32, #tpu.memory_space<vmem>>, vector<8x128xf32>
    tpu.vector_store %arg9[%c32, %c0_17], %70 {strides = array<i32>} : memref<48x128xf32, #tpu.memory_space<vmem>>, vector<8x128xf32>,
    %72 = vector.extract_strided_slice %45 {offsets = [2, 0, 0], sizes = [1, 8, 128], strides = [1, 1, 1]} : vector<3x8x128xf32> to vector<1x8x128xf32>
    %73 = vector.shape_cast %72 : vector<1x8x128xf32> to vector<8x128xf32>
    %c40 = arith.constant 40 : index
    %c0_18 = arith.constant 0 : index
    %74 = vector.load %arg9[%c40, %c0_18] : memref<48x128xf32, #tpu.memory_space<vmem>>, vector<8x128xf32>
    tpu.vector_store %arg9[%c40, %c0_18], %73 {strides = array<i32>} : memref<48x128xf32, #tpu.memory_space<vmem>>, vector<8x128xf32>,
    %c0_19 = arith.constant 0 : index
    %c0_20 = arith.constant 0 : index
    %75 = vector.load %arg5[%c0_19, %c0_20] : memref<192x48xf32, #tpu.memory_space<vmem>>, vector<192x48xf32>
    %c0_21 = arith.constant 0 : index
    %c0_22 = arith.constant 0 : index
    %76 = vector.load %arg9[%c0_21, %c0_22] : memref<48x128xf32, #tpu.memory_space<vmem>>, vector<48x128xf32>
    %cst_23 = arith.constant dense<0.000000e+00> : vector<192x128xf32>
    %77 = tpu.matmul %75, %76, %cst_23 {dimension_numbers = #tpu.dot_dimension_numbers<[1], [0], [0], [1], [0, 0, 1, 1], [], []>} : vector<192x48xf32>, vector<48x128xf32>, vector<192x128xf32> -> vector<192x128xf32>
    %78 = vector.extract_strided_slice %77 {offsets = [0, 0], sizes = [32, 128], strides = [1, 1]} : vector<192x128xf32> to vector<32x128xf32>
    %79 = arith.negf %78 : vector<32x128xf32>
    %80 = math.exp %79 : vector<32x128xf32>
    %cst_24 = arith.constant 1.000000e+00 : f32
    %81 = vector.broadcast %cst_24 : f32 to vector<32x128xf32>
    %82 = arith.addf %81, %80 : vector<32x128xf32>
    %83 = arith.divf %81, %82 : vector<32x128xf32>
    %84 = vector.extract_strided_slice %77 {offsets = [32, 0], sizes = [64, 128], strides = [1, 1]} : vector<192x128xf32> to vector<64x128xf32>
    %85 = arith.negf %84 : vector<64x128xf32>
    %86 = math.exp %85 : vector<64x128xf32>
    %cst_25 = arith.constant 1.000000e+00 : f32
    %87 = vector.broadcast %cst_25 : f32 to vector<64x128xf32>
    %88 = arith.addf %87, %86 : vector<64x128xf32>
    %89 = arith.divf %87, %88 : vector<64x128xf32>
    %90 = arith.mulf %84, %89 : vector<64x128xf32>
    %c0_26 = arith.constant 0 : index
    %c0_27 = arith.constant 0 : index
    %91 = vector.load %arg10[%c0_26, %c0_27] : memref<160x128xf32, #tpu.memory_space<vmem>>, vector<64x128xf32>
    tpu.vector_store %arg10[%c0_26, %c0_27], %90 {strides = array<i32>} : memref<160x128xf32, #tpu.memory_space<vmem>>, vector<64x128xf32>,
    %92 = vector.extract_strided_slice %77 {offsets = [96, 0], sizes = [32, 128], strides = [1, 1]} : vector<192x128xf32> to vector<32x128xf32>
    %93 = arith.mulf %92, %83 : vector<32x128xf32>
    %c64 = arith.constant 64 : index
    %c0_28 = arith.constant 0 : index
    %94 = vector.load %arg10[%c64, %c0_28] : memref<160x128xf32, #tpu.memory_space<vmem>>, vector<32x128xf32>
    tpu.vector_store %arg10[%c64, %c0_28], %93 {strides = array<i32>} : memref<160x128xf32, #tpu.memory_space<vmem>>, vector<32x128xf32>,
    %95 = vector.extract_strided_slice %77 {offsets = [128, 0], sizes = [32, 128], strides = [1, 1]} : vector<192x128xf32> to vector<32x128xf32>
    %96 = arith.mulf %95, %83 : vector<32x128xf32>
    %c96 = arith.constant 96 : index
    %c0_29 = arith.constant 0 : index
    %97 = vector.load %arg10[%c96, %c0_29] : memref<160x128xf32, #tpu.memory_space<vmem>>, vector<32x128xf32>
    tpu.vector_store %arg10[%c96, %c0_29], %96 {strides = array<i32>} : memref<160x128xf32, #tpu.memory_space<vmem>>, vector<32x128xf32>,
    %98 = vector.extract_strided_slice %77 {offsets = [160, 0], sizes = [32, 128], strides = [1, 1]} : vector<192x128xf32> to vector<32x128xf32>
    %99 = arith.mulf %98, %83 : vector<32x128xf32>
    %c128 = arith.constant 128 : index
    %c0_30 = arith.constant 0 : index
    %100 = vector.load %arg10[%c128, %c0_30] : memref<160x128xf32, #tpu.memory_space<vmem>>, vector<32x128xf32>
    tpu.vector_store %arg10[%c128, %c0_30], %99 {strides = array<i32>} : memref<160x128xf32, #tpu.memory_space<vmem>>, vector<32x128xf32>,
    %c0_31 = arith.constant 0 : index
    %c0_32 = arith.constant 0 : index
    %101 = vector.load %arg6[%c0_31, %c0_32] : memref<40x160xf32, #tpu.memory_space<vmem>>, vector<40x160xf32>
    %c0_33 = arith.constant 0 : index
    %c0_34 = arith.constant 0 : index
    %102 = vector.load %arg10[%c0_33, %c0_34] : memref<160x128xf32, #tpu.memory_space<vmem>>, vector<160x128xf32>
    %cst_35 = arith.constant dense<0.000000e+00> : vector<40x128xf32>
    %103 = tpu.matmul %101, %102, %cst_35 {dimension_numbers = #tpu.dot_dimension_numbers<[1], [0], [0], [1], [0, 0, 1, 1], [], []>} : vector<40x160xf32>, vector<160x128xf32>, vector<40x128xf32> -> vector<40x128xf32>
    %104 = vector.extract_strided_slice %103 {offsets = [0, 0], sizes = [16, 128], strides = [1, 1]} : vector<40x128xf32> to vector<16x128xf32>
    %c0_36 = arith.constant 0 : index
    %c0_37 = arith.constant 0 : index
    %105 = vector.load %arg7[%c0_36, %c0_37] : memref<16x128xf32, #tpu.memory_space<vmem>>, vector<16x128xf32>
    tpu.vector_store %arg7[%c0_36, %c0_37], %104 {strides = array<i32>} : memref<16x128xf32, #tpu.memory_space<vmem>>, vector<16x128xf32>,
    %106 = vector.extract_strided_slice %103 {offsets = [16, 0], sizes = [8, 128], strides = [1, 1]} : vector<40x128xf32> to vector<8x128xf32>
    %c0_38 = arith.constant 0 : index
    %c0_39 = arith.constant 0 : index
    %c0_40 = arith.constant 0 : index
    %107 = vector.load %arg8[%c0_38, %c0_39, %c0_40] : memref<3x8x128xf32, #tpu.memory_space<vmem>>, vector<1x8x128xf32>
    %108 = vector.shape_cast %107 : vector<1x8x128xf32> to vector<8x128xf32>
    %109 = vector.shape_cast %106 : vector<8x128xf32> to vector<1x8x128xf32>
    tpu.vector_store %arg8[%c0_38, %c0_39, %c0_40], %109 {strides = array<i32>} : memref<3x8x128xf32, #tpu.memory_space<vmem>>, vector<1x8x128xf32>,
    %110 = vector.extract_strided_slice %103 {offsets = [24, 0], sizes = [8, 128], strides = [1, 1]} : vector<40x128xf32> to vector<8x128xf32>
    %c1 = arith.constant 1 : index
    %c0_41 = arith.constant 0 : index
    %c0_42 = arith.constant 0 : index
    %111 = vector.load %arg8[%c1, %c0_41, %c0_42] : memref<3x8x128xf32, #tpu.memory_space<vmem>>, vector<1x8x128xf32>
    %112 = vector.shape_cast %111 : vector<1x8x128xf32> to vector<8x128xf32>
    %113 = vector.shape_cast %110 : vector<8x128xf32> to vector<1x8x128xf32>
    tpu.vector_store %arg8[%c1, %c0_41, %c0_42], %113 {strides = array<i32>} : memref<3x8x128xf32, #tpu.memory_space<vmem>>, vector<1x8x128xf32>,
    %114 = vector.extract_strided_slice %103 {offsets = [32, 0], sizes = [8, 128], strides = [1, 1]} : vector<40x128xf32> to vector<8x128xf32>
    %c2 = arith.constant 2 : index
    %c0_43 = arith.constant 0 : index
    %c0_44 = arith.constant 0 : index
    %115 = vector.load %arg8[%c2, %c0_43, %c0_44] : memref<3x8x128xf32, #tpu.memory_space<vmem>>, vector<1x8x128xf32>
    %116 = vector.shape_cast %115 : vector<1x8x128xf32> to vector<8x128xf32>
    %117 = vector.shape_cast %114 : vector<8x128xf32> to vector<1x8x128xf32>
    tpu.vector_store %arg8[%c2, %c0_43, %c0_44], %117 {strides = array<i32>} : memref<3x8x128xf32, #tpu.memory_space<vmem>>, vector<1x8x128xf32>,
    return
  }
  func.func @transform_0(%arg0: i32) -> (i32, i32) {
    %c0_i32 = arith.constant 0 : i32
    %c0_i32_0 = arith.constant 0 : i32
    return %c0_i32, %arg0 : i32, i32
  }
  func.func @transform_1(%arg0: i32) -> (i32, i32, i32) {
    %c0_i32 = arith.constant 0 : i32
    %c0_i32_0 = arith.constant 0 : i32
    %c0_i32_1 = arith.constant 0 : i32
    return %c0_i32, %c0_i32_0, %arg0 : i32, i32, i32
  }
  func.func @transform_2(%arg0: i32) -> (i32, i32) {
    %c0_i32 = arith.constant 0 : i32
    %c0_i32_0 = arith.constant 0 : i32
    %c0_i32_1 = arith.constant 0 : i32
    return %c0_i32, %c0_i32_0 : i32, i32
  }
  func.func @transform_3(%arg0: i32) -> (i32, i32) {
    %c0_i32 = arith.constant 0 : i32
    %c0_i32_0 = arith.constant 0 : i32
    %c0_i32_1 = arith.constant 0 : i32
    return %c0_i32, %c0_i32_0 : i32, i32
  }
  func.func @transform_4(%arg0: i32) -> (i32, i32) {
    %c0_i32 = arith.constant 0 : i32
    %c0_i32_0 = arith.constant 0 : i32
    %c0_i32_1 = arith.constant 0 : i32
    return %c0_i32, %c0_i32_0 : i32, i32
  }
  func.func @transform_5(%arg0: i32) -> (i32, i32) {
    %c0_i32 = arith.constant 0 : i32
    %c0_i32_0 = arith.constant 0 : i32
    %c0_i32_1 = arith.constant 0 : i32
    return %c0_i32, %c0_i32_0 : i32, i32
  }
  func.func @transform_6(%arg0: i32) -> (i32, i32) {
    %c0_i32 = arith.constant 0 : i32
    %c0_i32_0 = arith.constant 0 : i32
    return %c0_i32, %arg0 : i32, i32
  }
  func.func @transform_7(%arg0: i32) -> (i32, i32, i32) {
    %c0_i32 = arith.constant 0 : i32
    %c0_i32_0 = arith.constant 0 : i32
    %c0_i32_1 = arith.constant 0 : i32
    return %c0_i32, %c0_i32_0, %arg0 : i32, i32, i32
  }
}

</mosaic_0001>

<bundles_post_ra>
// kernel: feed_forward_pallas.1
= control target key start
LH: loop header
LB: loop body
LE: loop exit
PB: predicated region body
PF: predicated region fallthrough
CT: control target
= control target key end

     0   :  { %v872_v0 = vmov 0   ;;  %vm130_vm0 = vcmask 392192   ;;  %vm530_vm3 = vcmask 261120   ;;  %s1138_s3 = inlined_call_operand.vmem [shape: f32[8,1], index: 3, kind: input, shape index: {}]   ;;  %s1139_s2 = inlined_call_operand.vmem [shape: f32[16,1], index: 2, kind: input, shape index: {}]   ;;  %s1140_s4 = inlined_call_operand.vmem [shape: f32[192,48], index: 4, kind: input, shape index: {}]   ;;  %s1141_s1 = inlined_call_operand.vmem [shape: f32[3,8,128], index: 1, kind: input, shape index: {}]   ;;  %s1142_s0 = inlined_call_operand.vmem [shape: f32[16,128], index: 0, kind: input, shape index: {}]   ;;  %s1143_s5 = inlined_call_operand.vmem [shape: f32[40,160], index: 5, kind: input, shape index: {}]   ;;  %s1144_s6 = inlined_call_operand.vmem [shape: f32[16,128], index: 6, kind: output, shape index: {0}]   ;;  %s1145_s7 = inlined_call_operand.vmem [shape: f32[3,8,128], index: 7, kind: output, shape index: {1}]  }
   0x1   :  { %816 = vset.pattern.permute.xlu0 %v872_v0  ;;  %v72_v1 = vld [vmem:[%s1138_s3] sm:$0xff]  ;;  %817 = vset.pattern.permute.xlu1 %v872_v0  ;;  %v45_v2 = vld [vmem:[%s1139_s2 + $0x8] sm:$0xff]  ;;  %v29_v11 = vld [vmem:[%s1141_s1 + $0x10] sm:$0xff] }
   0x2   :  { %75 = vperm.xlu0 %816, %v72_v1   ;;  %53 = vperm.xlu1 %817, %v45_v2   ;;  %v44_v3 = vld [vmem:[%s1139_s2] sm:$0xff]  ;;  %v28_v6 = vld [vmem:[%s1141_s1 + $0x8] sm:$0xff]  ;;  %v61_v15 = vmul.f32 %v29_v11, %v29_v11  ;;  %v102_v61 = vld [vmem:[%s1140_s4 + $0x10] sm:$0xff] }
   0x3   :  { %v100_v4 = vld [vmem:[%s1140_s4] sm:$0xff]  ;;  %v26_v8 = vld [vmem:[%s1142_s0 + $0x8] sm:$0xff]  ;;  %v59_v10 = vmul.f32 %v28_v6, %v28_v6  ;;  %v103_v62 = vld [vmem:[%s1140_s4 + $0x18] sm:$0xff] }
   0x4   :  { %736 = vmatprep.mubr.msk.f32.mxu0 %vm130_vm0, %v100_v4  ;;  %v27_v5 = vld [vmem:[%s1141_s1] sm:$0xff]  ;;  %v31_v13 = vmul.f32 %v26_v8, %v26_v8  ;;  %v101_v60 = vld [vmem:[%s1140_s4 + $0x8] sm:$0xff]  ;;  %v106_v1 = vld [vmem:[%s1140_s4 + $0x30] sm:$0xff] }
   0x5   :  { %v25_v7 = vld [vmem:[%s1142_s0] sm:$0xff]  ;;  %v58_v9 = vmul.f32 %v27_v5, %v27_v5  ;;  %v105_v0 = vld [vmem:[%s1140_s4 + $0x28] sm:$0xff]  ;;  %v107_v2 = vld [vmem:[%s1140_s4 + $0x38] sm:$0xff] }
   0x6   :  { %48 = vperm.xlu0 %816, %v44_v3   ;;  %v30_v12 = vmul.f32 %v25_v7, %v25_v7  ;;  %v104_v63 = vld [vmem:[%s1140_s4 + $0x20] sm:$0xff]  ;;  %v109_v4 = vld [vmem:[%s1140_s4 + $0x48] sm:$0xff] }
   0x7   :  { %v60_v14 = vadd.f32 %v59_v10, %v58_v9  ;;  %v108_v3 = vld [vmem:[%s1140_s4 + $0x40] sm:$0xff]  ;;  %v114_v9 = vld [vmem:[%s1140_s4 + $0x70] sm:$0xff]  ;;  %v115_v10 = vld [vmem:[%s1140_s4 + $0x78] sm:$0xff] }
   0x8   :  { %v32_v16 = vadd.f32 %v31_v13, %v30_v12  ;;  %v117_v12 = vld [vmem:[%s1140_s4 + $0x88] sm:$0xff]  ;;  %v118_v13 = vld [vmem:[%s1140_s4 + $0x90] sm:$0xff] }
   0x9   :  { %v62_v17 = vadd.f32 %v61_v15, %v60_v14  ;;  %v119_v14 = vld [vmem:[%s1140_s4 + $0x98] sm:$0xff]  ;;  %v120_v15 = vld [vmem:[%s1140_s4 + $0xa0] sm:$0xff] }
   0xa   :  { %v33_v18 = vrot.slane %v32_v16, 4 }
   0xb   :  { %v63_v19 = vrot.slane %v62_v17, 4 }
   0xc   :  { %v34_v20 = vadd.f32 %v33_v18, %v32_v16  ;;  %v121_v16 = vld [vmem:[%s1140_s4 + $0xa8] sm:$0xff]  ;;  %v123_v18 = vld [vmem:[%s1140_s4 + $0xb8] sm:$0xff] }
   0xd   :  { %v64_v21 = vadd.f32 %v63_v19, %v62_v17  ;;  %v122_v17 = vld [vmem:[%s1140_s4 + $0xb0] sm:$0xff]  ;;  %v873_v19 = vmov 0.0|0.0  }
   0xe   :  { %v35_v22 = vrot.slane %v34_v20, 2  ;;  %784 = vmatprep.subr.bf16.mxu1 %v873_v19 }
   0xf   :  { %v65_v23 = vrot.slane %v64_v21, 2 }
  0x10   :  { %v36_v24 = vadd.f32 %v35_v22, %v34_v20  ;;  %v501_v20 = vld [vmem:[%s1143_s5 + $0x8] sm:$0xff] }
  0x11   :  { %v66_v25 = vadd.f32 %v65_v23, %v64_v21  ;;  %687 = vmatprep.mubr.msk.f32.mxu1 %vm530_vm3, %v501_v20 }
  0x12   :  { %v37_v26 = vrot.slane %v36_v24, 1 }
  0x13   :  { %v67_v27 = vrot.slane %v66_v25, 1 }
  0x14   :  { %v38_v28 = vadd.f32 %v37_v26, %v36_v24 }
  0x15   :  { %v68_v29 = vadd.f32 %v67_v27, %v66_v25 }
  0x16   :  { %v39_v30 = vmul.f32 0.0625, %v38_v28 }
  0x17   :  { %v69_v31 = vmul.f32 0.125, %v68_v29 }
  0x18   :  { %v40_v32 = vmax.f32 %v39_v30, 1e-24 }
  0x19   :  { %v70_v33 = vmax.f32 %v69_v31, 1e-24 }
  0x1a   :  { %818 = vrsqrt.f32 %v40_v32 }
  0x1b   :  { %820 = vrsqrt.f32 %v70_v33 }
  0x24   :  { %v819_v34 = vpop.eup %818 }
  0x25   :  { %v821_v35 = vpop.eup %820  ;;  %v43_v36 = vmul.f32 %v819_v34, %v26_v8  ;;  %v42_v40 = vmul.f32 %v819_v34, %v25_v7  ;;  %v112_v7 = vld [vmem:[%s1140_s4 + $0x60] sm:$0xff]  ;;  %v113_v8 = vld [vmem:[%s1140_s4 + $0x68] sm:$0xff] }
  0x81   :  { %v76_v37 = vpop.permute.xlu0 %75  ;;  %v54_v38 = vpop.permute.xlu1 %53 }
  0x82   :  { %v78_v39 = vmul.f32 %v821_v35, %v76_v37  ;;  %v57_v44 = vmul.f32 %v54_v38, %v43_v36 }
  0x84   :  { %v79_v41 = vmul.f32 %v78_v39, %v27_v5  ;;  %v80_v42 = vmul.f32 %v78_v39, %v28_v6  ;;  %v81_v43 = vmul.f32 %v78_v39, %v29_v11  ;;  %v110_v5 = vld [vmem:[%s1140_s4 + $0x50] sm:$0xff]  ;;  %v111_v6 = vld [vmem:[%s1140_s4 + $0x58] sm:$0xff]  ;;  %v116_v11 = vld [vmem:[%s1140_s4 + $0x80] sm:$0xff] }
  0x85   :  { %v49_v45 = vpop.permute.xlu0 %48 }
  0x86   :  { %v82_v46 = vmul.f32 %v79_v41, %v79_v41  ;;  %v83_v47 = vmul.f32 %v80_v42, %v80_v42  ;;  %v56_v48 = vmul.f32 %v49_v45, %v42_v40  ;;  %v85_v50 = vmul.f32 %v81_v43, %v81_v43 }
  0x87   :  { %v780_v59 = vpack.c.bf16 %v81_v43, %v80_v42 }
  0x88   :  { %v84_v49 = vadd.f32 %v83_v47, %v82_v46  ;;  %v772_v51 = vpack.c.bf16 %v57_v44, %v56_v48 }
  0x8a   :  { %v86_v52 = vadd.f32 %v85_v50, %v84_v49  ;;  %773 = vmatprep.subr.bf16.mxu0 %v772_v51 }
  0x8b   :  { %775 = vmatpush3.bf16.msra.mxu0 %v772_v51 }
  0x8c   :  { %822 = vrsqrt.f32 %v86_v52  ;;  %vm89_vm1 = vcmp.eq.f32.partialorder %v86_v52, inf  ;;  %v92_v55 = vand.u32 2147483648, %v86_v52  ;;  %vm91_vm2 = vcmp.eq.f32.partialorder %v86_v52, 0.0 }
  0x96   :  { %v823_v53 = vpop.eup %822 }
  0x97   :  { %v88_v54 = vmul.f32 %v823_v53, %v86_v52 }
  0x99   :  { %v90_v56 = vsel %vm89_vm1, %v86_v52, %v88_v54 }
  0x9a   :  { %v93_v57 = vsel %vm91_vm2, %v92_v55, %v90_v56 }
  0x9b   :  { %v776_v58 = vpack.c.bf16 %v79_v41, %v93_v57 }
  0x9d   :  { %777 = vmatprep.subr.bf16.mxu0 %v776_v58 }
  0x9e   :  { %779 = vmatpush3.bf16.msra.mxu0 %v776_v58 }
  0x9f   :  { %781 = vmatprep.subr.bf16.mxu0 %v780_v59 }
  0xa2   :  { %783 = vmatpush3.bf16.msra.mxu0 %v780_v59 }
  0xa5   :  { %737 = vmatmul.mubr.msk.f32.vlgmr.msra.gmra.mrb[0].mxu0 %vm130_vm0, %v101_v60 }
  0xa6   :  { %739 = vmatprep.mubr.msk.f32.mxu0 %vm130_vm0, %v102_v61 }
  0xa9   :  { %740 = vmatmul.mubr.msk.f32.gmra.mrb[2].mxu0 %vm130_vm0, %v103_v62 }
  0xaa   :  { %742 = vmatprep.mubr.msk.f32.mxu0 %vm130_vm0, %v104_v63 }
  0xad   :  { %743 = vmatmul.mubr.msk.f32.gmra.mrb[4].mxu0 %vm130_vm0, %v105_v0 }
  0xae   :  { %745 = vmatprep.mubr.msk.f32.mxu0 %vm130_vm0, %v106_v1 }
  0xb1   :  { %746 = vmatmul.mubr.msk.f32.gmra.mrb[6].mxu0 %vm130_vm0, %v107_v2 }
  0xb2   :  { %748 = vmatprep.mubr.msk.f32.mxu0 %vm130_vm0, %v108_v3 }
  0xb5   :  { %749 = vmatmul.mubr.msk.f32.gmra.mrb[8].mxu0 %vm130_vm0, %v109_v4 }
  0xb6   :  { %751 = vmatprep.mubr.msk.f32.mxu0 %vm130_vm0, %v110_v5 }
  0xb9   :  { %752 = vmatmul.mubr.msk.f32.gmra.mrb[10].mxu0 %vm130_vm0, %v111_v6 }
  0xba   :  { %754 = vmatprep.mubr.msk.f32.mxu0 %vm130_vm0, %v112_v7 }
  0xbd   :  { %755 = vmatmul.mubr.msk.f32.gmra.mrb[12].mxu0 %vm130_vm0, %v113_v8 }
  0xbe   :  { %757 = vmatprep.mubr.msk.f32.mxu0 %vm130_vm0, %v114_v9 }
  0xc1   :  { %758 = vmatmul.mubr.msk.f32.gmra.mrb[14].mxu0 %vm130_vm0, %v115_v10 }
  0xc2   :  { %760 = vmatprep.mubr.msk.f32.mxu0 %vm130_vm0, %v116_v11 }
  0xc5   :  { %761 = vmatmul.mubr.msk.f32.gmra.mrb[16].mxu0 %vm130_vm0, %v117_v12 }
  0xc6   :  { %763 = vmatprep.mubr.msk.f32.mxu0 %vm130_vm0, %v118_v13 }
  0xc9   :  { %764 = vmatmul.mubr.msk.f32.gmra.mrb[18].mxu0 %vm130_vm0, %v119_v14 }
  0xca   :  { %766 = vmatprep.mubr.msk.f32.mxu0 %vm130_vm0, %v120_v15 }
  0xcd   :  { %767 = vmatmul.mubr.msk.f32.gmra.mrb[20].mxu0 %vm130_vm0, %v121_v16 }
  0xce   :  { %769 = vmatprep.mubr.msk.f32.mxu0 %vm130_vm0, %v122_v17 }
  0xd1   :  { %770 = vmatmul.mubr.msk.f32.gmra.mrb[22].mxu0 %vm130_vm0, %v123_v18 }
 0x178   :  { %v738_v21 = vpop.f32.mrb[0].mxu0 }
 0x179   :  { %v676_v22 = vmul.f32 -1.442695, %v738_v21  ;;  %v269_v23 = vpop.f32.mrb[1].mxu0 }
 0x17a   :  { %v675_v24 = vmul.f32 -1.442695, %v269_v23 }
 0x17b   :  { %824 = vpow2.f32 %v676_v22 }
 0x17c   :  { %826 = vpow2.f32 %v675_v24  ;;  %v741_v25 = vpop.f32.mrb[2].mxu0 }
 0x17d   :  { %v678_v26 = vmul.f32 -1.442695, %v741_v25  ;;  %v279_v27 = vpop.f32.mrb[3].mxu0 }
 0x17e   :  { %v677_v28 = vmul.f32 -1.442695, %v279_v27 }
 0x17f   :  { %828 = vpow2.f32 %v678_v26 }
 0x180   :  { %830 = vpow2.f32 %v677_v28  ;;  %v1039_v29 = vpop.f32.mrb[4].mxu0 }
 0x181   :  { %v680_v30 = vmul.f32 -1.442695, %v1039_v29  ;;  %v1042_v31 = vpop.f32.mrb[5].mxu0 }
 0x182   :  { %v679_v32 = vmul.f32 -1.442695, %v1042_v31 }
 0x183   :  { %832 = vpow2.f32 %v680_v30 }
 0x184   :  { %834 = vpow2.f32 %v679_v32  ;;  %v1045_v33 = vpop.f32.mrb[6].mxu0 }
 0x185   :  { %v825_v34 = vpop.eup %824  ;;  %v682_v35 = vmul.f32 -1.442695, %v1045_v33  ;;  %v1048_v36 = vpop.f32.mrb[7].mxu0 }
 0x186   :  { %v827_v37 = vpop.eup %826  ;;  %v401_v38 = vadd.f32 1.0, %v825_v34  ;;  %v681_v39 = vmul.f32 -1.442695, %v1048_v36 }
 0x187   :  { %v400_v40 = vadd.f32 1.0, %v827_v37  ;;  %836 = vpow2.f32 %v682_v35 }
 0x188   :  { %838 = vrcp.f32 %v401_v38  ;;  %v1051_v41 = vpop.f32.mrb[8].mxu0 }
 0x189   :  { %v829_v42 = vpop.eup %828  ;;  %840 = vrcp.f32 %v400_v40  ;;  %v684_v43 = vmul.f32 -1.442695, %v1051_v41  ;;  %v1054_v44 = vpop.f32.mrb[9].mxu0 }
 0x18a   :  { %v831_v45 = vpop.eup %830  ;;  %v403_v46 = vadd.f32 1.0, %v829_v42  ;;  %842 = vpow2.f32 %v681_v39  ;;  %v683_v47 = vmul.f32 -1.442695, %v1054_v44 }
 0x18b   :  { %v402_v48 = vadd.f32 1.0, %v831_v45  ;;  %844 = vpow2.f32 %v684_v43 }
 0x18c   :  { %846 = vrcp.f32 %v403_v46  ;;  %v1057_v49 = vpop.f32.mrb[10].mxu0 }
 0x18d   :  { %v833_v50 = vpop.eup %832  ;;  %848 = vrcp.f32 %v402_v48  ;;  %v686_v51 = vmul.f32 -1.442695, %v1057_v49  ;;  %v1060_v52 = vpop.f32.mrb[11].mxu0 }
 0x18e   :  { %v835_v53 = vpop.eup %834  ;;  %v437_v54 = vadd.f32 1.0, %v833_v50  ;;  %850 = vpow2.f32 %v683_v47  ;;  %v685_v55 = vmul.f32 -1.442695, %v1060_v52 }
 0x18f   :  { %v436_v56 = vadd.f32 1.0, %v835_v53  ;;  %852 = vpow2.f32 %v686_v51 }
 0x190   :  { %854 = vrcp.f32 %v437_v54  ;;  %v756_v57 = vpop.f32.mrb[12].mxu0 }
 0x191   :  { %v837_v58 = vpop.eup %836  ;;  %856 = vrcp.f32 %v436_v56  ;;  %v329_v59 = vpop.f32.mrb[13].mxu0 }
 0x192   :  { %v839_v60 = vpop.eup %838  ;;  %v439_v61 = vadd.f32 1.0, %v837_v58  ;;  %858 = vpow2.f32 %v685_v55 }
 0x193   :  { %v841_v62 = vpop.eup %840  ;;  %v1063_v63 = vmul.f32 %v839_v60, %v756_v57 }
 0x194   :  { %v843_v0 = vpop.eup %842  ;;  %860 = vrcp.f32 %v439_v61  ;;  %v1065_v1 = vmul.f32 %v841_v62, %v329_v59  ;;  %v759_v2 = vpop.f32.mrb[14].mxu0 }
 0x195   :  { %v845_v3 = vpop.eup %844  ;;  %v438_v4 = vadd.f32 1.0, %v843_v0  ;;  %v339_v5 = vpop.f32.mrb[15].mxu0  ;;  %v507_v0 = vld [vmem:[%s1143_s5 + $0x38] sm:$0xff] }
 0x196   :  { %v847_v6 = vpop.eup %846  ;;  %v441_v7 = vadd.f32 1.0, %v845_v3  ;;  %v797_v8 = vpack.c.bf16 %v1063_v63, %v1065_v1  ;;  %v504_v63 = vld [vmem:[%s1143_s5 + $0x20] sm:$0xff]  ;;  %v506_v1 = vld [vmem:[%s1143_s5 + $0x30] sm:$0xff] }
 0x197   :  { %v849_v9 = vpop.eup %848  ;;  %862 = vrcp.f32 %v438_v4  ;;  %v1069_v10 = vmul.f32 %v847_v6, %v759_v2  ;;  %v509_v2 = vld [vmem:[%s1143_s5 + $0x48] sm:$0xff]  ;;  %v508_v3 = vld [vmem:[%s1143_s5 + $0x40] sm:$0xff] }
 0x198   :  { %v851_v11 = vpop.eup %850  ;;  %864 = vrcp.f32 %v441_v7  ;;  %v478_v12 = vmul.f32 %v849_v9, %v339_v5  ;;  %v762_v13 = vpop.f32.mrb[16].mxu0 }
 0x199   :  { %v853_v14 = vpop.eup %852  ;;  %v440_v15 = vadd.f32 1.0, %v851_v11  ;;  %v485_v16 = vmul.f32 %v839_v60, %v762_v13  ;;  %v349_v17 = vpop.f32.mrb[17].mxu0 }
 0x19a   :  { %v855_v18 = vpop.eup %854  ;;  %v443_v20 = vadd.f32 1.0, %v853_v14  ;;  %v800_v21 = vpack.c.bf16 %v1069_v10, %v478_v12  ;;  %v484_v22 = vmul.f32 %v841_v62, %v349_v17 }
 0x19b   :  { %v857_v23 = vpop.eup %856  ;;  %v461_v24 = vmul.f32 %v855_v18, %v1039_v29  ;;  %866 = vrcp.f32 %v440_v15 }
 0x19c   :  { %v859_v25 = vpop.eup %858  ;;  %v460_v26 = vmul.f32 %v857_v23, %v1042_v31  ;;  %868 = vrcp.f32 %v443_v20  ;;  %v803_v27 = vpack.c.bf16 %v485_v16, %v484_v22  ;;  %v765_v28 = vpop.f32.mrb[18].mxu0 }
 0x19d   :  { %v442_v30 = vadd.f32 1.0, %v859_v25  ;;  %v487_v32 = vmul.f32 %v847_v6, %v765_v28  ;;  %v359_v34 = vpop.f32.mrb[19].mxu0 }
 0x19e   :  { %v861_v35 = vpop.eup %860  ;;  %v486_v37 = vmul.f32 %v849_v9, %v359_v34  ;;  %v785_v38 = vpack.c.bf16 %v461_v24, %v460_v26 }
 0x19f   :  { %870 = vrcp.f32 %v442_v30  ;;  %v463_v39 = vmul.f32 %v861_v35, %v1045_v33 }
 0x1a0   :  { %v806_v40 = vpack.c.bf16 %v487_v32, %v486_v37  ;;  %v768_v42 = vpop.f32.mrb[20].mxu0  ;;  %786 = vmatpush1.bf16.msra.mxu1 %v785_v38 }
 0x1a1   :  { %v863_v29 = vpop.eup %862  ;;  %v493_v43 = vmul.f32 %v839_v60, %v768_v42  ;;  %v369_v45 = vpop.f32.mrb[21].mxu0  ;;  %787 = vmatprep.subr.bf16.mxu1 %v873_v19 }
 0x1a2   :  { %v865_v31 = vpop.eup %864  ;;  %v462_v46 = vmul.f32 %v863_v29, %v1048_v36  ;;  %v492_v47 = vmul.f32 %v841_v62, %v369_v45 }
 0x1a3   :  { %v465_v50 = vmul.f32 %v865_v31, %v1051_v41 }
 0x1a4   :  { %v788_v48 = vpack.c.bf16 %v463_v39, %v462_v46  ;;  %v809_v51 = vpack.c.bf16 %v493_v43, %v492_v47  ;;  %v771_v53 = vpop.f32.mrb[22].mxu0 }
 0x1a5   :  { %v867_v54 = vpop.eup %866  ;;  %v495_v55 = vmul.f32 %v847_v6, %v771_v53  ;;  %v379_v33 = vpop.f32.mrb[23].mxu0 }
 0x1a6   :  { %v869_v56 = vpop.eup %868  ;;  %v464_v57 = vmul.f32 %v867_v54, %v1054_v44  ;;  %789 = vmatpush1.bf16.msra.mxu1 %v788_v48  ;;  %v494_v58 = vmul.f32 %v849_v9, %v379_v33  ;;  %v500_v44 = vld [vmem:[%s1143_s5] sm:$0xff] }
 0x1a7   :  { %790 = vmatprep.subr.bf16.mxu1 %v873_v19  ;;  %v467_v60 = vmul.f32 %v869_v56, %v1057_v49  ;;  %v503_v49 = vld [vmem:[%s1143_s5 + $0x18] sm:$0xff] }
 0x1a8   :  { %v791_v59 = vpack.c.bf16 %v465_v50, %v464_v57  ;;  %v812_v36 = vpack.c.bf16 %v495_v55, %v494_v58 }
 0x1a9   :  { %v871_v61 = vpop.eup %870 }
 0x1aa   :  { %v466_v62 = vmul.f32 %v871_v61, %v1060_v52  ;;  %792 = vmatpush1.bf16.msra.mxu1 %v791_v59  ;;  %v502_v52 = vld [vmem:[%s1143_s5 + $0x10] sm:$0xff] }
 0x1ab   :  { %793 = vmatprep.subr.bf16.mxu1 %v873_v19 }
 0x1ac   :  { %v794_v41 = vpack.c.bf16 %v467_v60, %v466_v62 }
 0x1ae   :  { %795 = vmatpush1.bf16.msra.mxu1 %v794_v41 }
 0x1af   :  { %796 = vmatprep.subr.bf16.mxu1 %v873_v19 }
 0x1b2   :  { %798 = vmatpush1.bf16.msra.mxu1 %v797_v8 }
 0x1b3   :  { %799 = vmatprep.subr.bf16.mxu1 %v873_v19 }
 0x1b6   :  { %801 = vmatpush1.bf16.msra.mxu1 %v800_v21 }
 0x1b7   :  { %802 = vmatprep.subr.bf16.mxu1 %v873_v19 }
 0x1ba   :  { %804 = vmatpush1.bf16.msra.mxu1 %v803_v27 }
 0x1bb   :  { %805 = vmatprep.subr.bf16.mxu1 %v873_v19 }
 0x1be   :  { %807 = vmatpush1.bf16.msra.mxu1 %v806_v40 }
 0x1bf   :  { %808 = vmatprep.subr.bf16.mxu1 %v873_v19 }
 0x1c2   :  { %810 = vmatpush1.bf16.msra.mxu1 %v809_v51 }
 0x1c3   :  { %811 = vmatprep.subr.bf16.mxu1 %v873_v19  ;;  %v505_v19 = vld [vmem:[%s1143_s5 + $0x28] sm:$0xff] }
 0x1c6   :  { %813 = vmatpush1.bf16.msra.mxu1 %v812_v36 }
 0x1c9   :  { %611 = vmatmul.mubr.f32.vlgmr.msra.gmra.mrb[0].mxu1 %v500_v44 }
 0x1ca   :  { %688 = vmatprep.mubr.msk.f32.mxu1 %vm530_vm3, %v503_v49 }
 0x1cd   :  { %616 = vmatmul.mubr.f32.gmra.mrb[2].mxu1 %v502_v52 }
 0x1ce   :  { %689 = vmatprep.mubr.msk.f32.mxu1 %vm530_vm3, %v505_v19 }
 0x1d1   :  { %621 = vmatmul.mubr.f32.gmra.mrb[4].mxu1 %v504_v63 }
 0x1d2   :  { %690 = vmatprep.mubr.msk.f32.mxu1 %vm530_vm3, %v507_v0 }
 0x1d5   :  { %626 = vmatmul.mubr.f32.gmra.mrb[6].mxu1 %v506_v1 }
 0x1d6   :  { %691 = vmatprep.mubr.msk.f32.mxu1 %vm530_vm3, %v509_v2 }
 0x1d9   :  { %631 = vmatmul.mubr.f32.gmra.mrb[8].mxu1 %v508_v3 }
 0x29c   :  { %v612_v4 = vpop.f32.mrb[0].mxu1 }
 0x29d   :  { %636 = vst [vmem:[%s1144_s6] sm:$0xff] %v612_v4  ;;  %v614_v5 = vpop.f32.mrb[1].mxu1 }
 0x2a0   :  { %v617_v6 = vpop.f32.mrb[2].mxu1 }
 0x2a1   :  { %637 = vst [vmem:[%s1144_s6 + $0x8] sm:$0xff] %v617_v6  ;;  %v619_v7 = vpop.f32.mrb[3].mxu1 }
 0x2a4   :  { %v622_v8 = vpop.f32.mrb[4].mxu1 }
 0x2a5   :  { %638 = vst [vmem:[%s1145_s7] sm:$0xff] %v622_v8  ;;  %v624_v9 = vpop.f32.mrb[5].mxu1 }
 0x2a8   :  { %v627_v10 = vpop.f32.mrb[6].mxu1 }
 0x2a9   :  { %692 = vst [vmem:[%s1145_s7 + $0x8] sm:$0xff] %v627_v10  ;;  %v629_v11 = vpop.f32.mrb[7].mxu1 }
 0x2ac   :  { %v632_v12 = vpop.f32.mrb[8].mxu1 }
 0x2ad   :  { %693 = vst [vmem:[%s1145_s7 + $0x10] sm:$0xff] %v632_v12  ;;  %v634_v13 = vpop.f32.mrb[9].mxu1 }

</bundles_post_ra>
